<compile_context>
chip_gen: v5e
topology: v5e:2x2
jax: 0.10.0
libtpu: 0.0.40
codegen_flags: <defaults>
</compile_context>

<pallas_src>
import jax
import jax.numpy as jnp
from jax.experimental import pallas as pl
from jax.experimental.pallas import tpu as pltpu


def _round_up(x, m):
    return ((x + m - 1) // m) * m


# --------------------- Path A: weights fully resident in VMEM ---------------------
def _ffn_resident_kernel(x_ref, w1_ref, b1_ref, w2_ref, b2_ref, o_ref):
    # x_ref:  (tm, d_model_p)       bf16     w1_ref: (d_model_p, d_ff_p) bf16
    # b1_ref: (1, d_ff_p)           f32      w2_ref: (d_ff_p, d_model_p) bf16
    # b2_ref: (1, d_model_p)        f32      o_ref:  (tm, d_model_p)     out dtype
    h = jnp.dot(x_ref[...], w1_ref[...], preferred_element_type=jnp.float32)
    h = jnp.maximum(h + b1_ref[...], 0.0)           # ReLU; dropout (eval) == identity
    y = jnp.dot(h.astype(w2_ref.dtype), w2_ref[...],
                preferred_element_type=jnp.float32)
    o_ref[...] = (y + b2_ref[...]).astype(o_ref.dtype)


# --------------------- Path B: d_ff tiled as a reduction axis ---------------------
def _ffn_reduce_kernel(x_ref, w1_ref, b1_ref, w2_ref, b2_ref, o_ref, acc_ref):
    # x_ref:  (tm, d_model_p)  bf16   w1_ref: (d_model_p, tff) bf16   b1_ref: (1, tff) f32
    # w2_ref: (tff, d_model_p) bf16   b2_ref: (1, d_model_p)   f32
    # o_ref:  (tm, d_model_p)  out    acc_ref:(tm, d_model_p)  f32 VMEM scratch
    k = pl.program_id(1)

    @pl.when(k == 0)
    def _():
        acc_ref[...] = jnp.zeros_like(acc_ref)

    h = jnp.dot(x_ref[...], w1_ref[...], preferred_element_type=jnp.float32)
    h = jnp.maximum(h + b1_ref[...], 0.0)           # ReLU; dropout (eval) == identity
    acc_ref[...] += jnp.dot(h.astype(w2_ref.dtype), w2_ref[...],
                            preferred_element_type=jnp.float32)

    @pl.when(k == pl.num_programs(1) - 1)
    def _():
        # b2 applied exactly once, in the finalize branch.
        o_ref[...] = (acc_ref[...] + b2_ref[...]).astype(o_ref.dtype)


_VMEM_BUDGET = 40 * 1024 * 1024     # working-set target (leaves headroom on v7x's 64 MiB)
_VMEM_CAP = 48 * 1024 * 1024        # hard cap handed to the compiler


def feed_forward(x, w1, b1, w2, b2, *, compute_dtype=jnp.bfloat16,
                 weights_resident=None, max_tff=None):
    """x: (..., d_model) -> (..., d_model).  Weights stored as (in, out):
    W1 (d_model, d_ff), W2 (d_ff, d_model).  Fused FFN
    (Linear -> ReLU -> Dropout[eval] -> Linear) on TPU."""
    orig_dtype = x.dtype
    d_model = x.shape[-1]
    d_ff = w1.shape[-1]
    lead = x.shape[:-1]
    M = 1
    for s in lead:
        M *= s

    # ---- tile / padding choices: lane-dense, (8,128)-aligned ----
    d_model_p = _round_up(d_model, 128)
    d_ff_p = _round_up(d_ff, 128)
    tm = min(256, _round_up(M, 16))          # rows per tile (MXU M dim)
    M_p = _round_up(M, tm)

    itm = jnp.dtype(compute_dtype).itemsize
    out_itm = jnp.dtype(orig_dtype).itemsize

    # ---- pad (zeros keep the math exact) and cast to the compute dtype ----
    x2 = x.reshape(M, d_model)
    x2 = jnp.pad(x2, ((0, M_p - M), (0, d_model_p - d_model))).astype(compute_dtype)
    w1_p = jnp.pad(w1, ((0, d_model_p - d_model), (0, d_ff_p - d_ff))).astype(compute_dtype)
    w2_p = jnp.pad(w2, ((0, d_ff_p - d_ff), (0, d_model_p - d_model))).astype(compute_dtype)
    b1_p = jnp.pad(b1, (0, d_ff_p - d_ff)).astype(jnp.float32).reshape(1, d_ff_p)
    b2_p = jnp.pad(b2, (0, d_model_p - d_model)).astype(jnp.float32).reshape(1, d_model_p)

    # ---- advisory cost estimate for the XLA scheduler (same for both paths) ----
    flops = 4 * M * d_model * d_ff                    # two matmuls, 2 flops per MAC
    bytes_accessed = (x2.size * itm + w1_p.size * itm + w2_p.size * itm
                      + b1_p.size * 4 + b2_p.size * 4 + M_p * d_model_p * out_itm)
    cost = pl.CostEstimate(flops=flops, transcendentals=0, bytes_accessed=bytes_accessed)

    # ---- Path A working-set estimate (conservative: 2 buffers per operand) ----
    resident_bytes = (2 * d_model_p * d_ff_p * itm * 2        # W1 + W2
                      + 2 * (d_ff_p + d_model_p) * 4          # biases
                      + 2 * tm * d_model_p * itm              # x tiles
                      + 2 * tm * d_model_p * out_itm          # output tiles
                      + tm * d_ff_p * (4 + itm)               # h (f32) + bf16 copy
                      + tm * d_model_p * 4)                   # f32 matmul result
    if weights_resident is None:
        weights_resident = resident_bytes <= _VMEM_BUDGET

    if weights_resident:
        # ------------------------------ Path A ------------------------------
        vmem_limit = int(min(max(resident_bytes + (2 << 20), 24 * 1024 * 1024), _VMEM_CAP))
        out = pl.pallas_call(
            _ffn_resident_kernel,
            out_shape=jax.ShapeDtypeStruct((M_p, d_model_p), orig_dtype),
            grid_spec=pltpu.PrefetchScalarGridSpec(
                num_scalar_prefetch=0,
                grid=(M_p // tm,),
                in_specs=[
                    pl.BlockSpec((tm, d_model_p), lambda i: (i, 0)),        # x tile
                    pl.BlockSpec((d_model_p, d_ff_p), lambda i: (0, 0)),    # W1 (resident)
                    pl.BlockSpec((1, d_ff_p), lambda i: (0, 0)),            # b1 (resident)
                    pl.BlockSpec((d_ff_p, d_model_p), lambda i: (0, 0)),    # W2 (resident)
                    pl.BlockSpec((1, d_model_p), lambda i: (0, 0)),         # b2 (resident)
                ],
                out_specs=pl.BlockSpec((tm, d_model_p), lambda i: (i, 0)),
            ),
            compiler_params=pltpu.CompilerParams(
                dimension_semantics=("parallel",),
                vmem_limit_bytes=vmem_limit,
            ),
            cost_estimate=cost,
        )(x2, w1_p, b1_p, w2_p, b2_p)
    else:
        # ------------------------------ Path B ------------------------------
        # Pick the largest d_ff slab (multiple of 128) whose working set fits the budget.
        def slab_bytes(tff):
            return (2 * tm * d_model_p * itm                 # x tiles
                    + 2 * d_model_p * tff * itm              # W1 slabs
                    + 2 * tff * d_model_p * itm              # W2 slabs
                    + 2 * (tff + d_model_p) * 4              # biases
                    + 2 * tm * d_model_p * out_itm           # output tiles
                    + tm * tff * (4 + itm)                   # h (f32) + bf16 copy
                    + tm * d_model_p * 4)                    # f32 accumulator

        tff_cap = d_ff_p if max_tff is None else min(_round_up(max_tff, 128), d_ff_p)
        tff = 128
        for cand in (d_ff_p, 4096, 2048, 1024, 512, 256, 128):
            if cand <= tff_cap and cand % 128 == 0 and d_ff_p % cand == 0 \
                    and slab_bytes(cand) <= _VMEM_BUDGET:
                tff = cand
                break

        vmem_limit = int(min(max(slab_bytes(tff) + (2 << 20), 24 * 1024 * 1024), _VMEM_CAP))
        out = pl.pallas_call(
            _ffn_reduce_kernel,
            out_shape=jax.ShapeDtypeStruct((M_p, d_model_p), orig_dtype),
            grid_spec=pltpu.PrefetchScalarGridSpec(
                num_scalar_prefetch=0,
                grid=(M_p // tm, d_ff_p // tff),
                in_specs=[
                    pl.BlockSpec((tm, d_model_p), lambda i, k: (i, 0)),     # x tile
                    pl.BlockSpec((d_model_p, tff), lambda i, k: (0, k)),    # W1 slab
                    pl.BlockSpec((1, tff), lambda i, k: (0, k)),            # b1 slab
                    pl.BlockSpec((tff, d_model_p), lambda i, k: (k, 0)),    # W2 slab
                    pl.BlockSpec((1, d_model_p), lambda i, k: (0, 0)),      # b2
                ],
                out_specs=pl.BlockSpec((tm, d_model_p), lambda i, k: (i, 0)),
                scratch_shapes=[pltpu.VMEM((tm, d_model_p), jnp.float32)],
            ),
            compiler_params=pltpu.CompilerParams(
                dimension_semantics=("parallel", "arbitrary"),
                vmem_limit_bytes=vmem_limit,
            ),
            cost_estimate=cost,
        )(x2, w1_p, b1_p, w2_p, b2_p)

    return out[:M, :d_model].reshape(*lead, d_model)


def init_params(key, d_model, d_ff, dtype=jnp.float32):
    """Deterministic init mimicking nn.Linear's uniform(-1/sqrt(fan_in), +)."""
    k1, k2, k3, k4 = jax.random.split(key, 4)
    lim1 = 1.0 / (d_model ** 0.5)
    lim2 = 1.0 / (d_ff ** 0.5)
    # Stored as (in_features, out_features) so the kernel does x @ W.
    w1 = jax.random.uniform(k1, (d_model, d_ff), dtype, -lim1, lim1)
    b1 = jax.random.uniform(k2, (d_ff,), dtype, -lim1, lim1)
    w2 = jax.random.uniform(k3, (d_ff, d_model), dtype, -lim2, lim2)
    b2 = jax.random.uniform(k4, (d_model,), dtype, -lim2, lim2)
    return w1, b1, w2, b2


def _reference_checks(y, x, w1, b1, w2, b2):
    # Tight check against a reference using the same bf16 inputs / f32 accumulation.
    xb = x.astype(jnp.bfloat16).astype(jnp.float32)
    w1b = w1.astype(jnp.bfloat16).astype(jnp.float32)
    w2b = w2.astype(jnp.bfloat16).astype(jnp.float32)
    h = jnp.maximum(xb @ w1b + b1, 0.0)
    ref_bf16 = h.astype(jnp.bfloat16).astype(jnp.float32) @ w2b + b2
    assert jnp.allclose(y, ref_bf16, atol=2e-3, rtol=2e-3)
    # Loose semantic check against the pure-f32 PyTorch-equivalent forward (eval dropout).
    ref_f32 = jnp.maximum(x @ w1 + b1, 0.0) @ w2 + b2
    assert jnp.allclose(y, ref_f32, atol=5e-2, rtol=5e-2)


if __name__ == "__main__":
    key = jax.random.PRNGKey(0)

    # ---- Path A (weights resident): small transformer-FFN-like shapes ----
    batch, seq, d_model, d_ff = 2, 8, 32, 64
    kx, kp = jax.random.split(key)
    x = jax.random.normal(kx, (batch, seq, d_model), jnp.float32)
    w1, b1, w2, b2 = init_params(kp, d_model, d_ff)

    y = feed_forward(x, w1, b1, w2, b2)
    jax.block_until_ready(y)
    assert y.shape == (batch, seq, d_model)
    _reference_checks(y, x, w1, b1, w2, b2)

    # ---- Path B (d_ff reduction axis, multi-step accumulator) forced for coverage ----
    d_ff2 = 320                                   # pads to 384 -> 3 slabs of 128
    kx2, kp2 = jax.random.split(kp)
    x2 = jax.random.normal(kx2, (batch, seq, d_model), jnp.float32)
    w1b_, b1b_, w2b_, b2b_ = init_params(kp2, d_model, d_ff2)
    y2 = feed_forward(x2, w1b_, b1b_, w2b_, b2b_,
                      weights_resident=False, max_tff=128)
    jax.block_until_ready(y2)
    assert y2.shape == (batch, seq, d_model)
    _reference_checks(y2, x2, w1b_, b1b_, w2b_, b2b_)

    print("KERNEL_OK")
</pallas_src>

<mosaic_0001>
module attributes {stable_mosaic.version = 11 : i64} {
  func.func @_ffn_resident_kernel(%arg0: i32, %arg1: memref<16x128xbf16, #tpu.memory_space<vmem>>, %arg2: memref<128x128xbf16, #tpu.memory_space<vmem>>, %arg3: memref<1x128xf32, #tpu.memory_space<vmem>>, %arg4: memref<128x128xbf16, #tpu.memory_space<vmem>>, %arg5: memref<1x128xf32, #tpu.memory_space<vmem>>, %arg6: memref<16x128xf32, #tpu.memory_space<vmem>>) attributes {dimension_semantics = [#tpu.dimension_semantics<parallel>], iteration_bounds = array<i64: 1>, scalar_prefetch = 0 : i64, scratch_operands = 0 : i64, tpu.core_type = #tpu.core_type<tc>, window_params = [{transform_indices = @transform_0, window_bounds = array<i64: 16, 128>}, {pipeline_mode = #tpu.pipeline_mode<synchronous>, transform_indices = @transform_1, window_bounds = array<i64: 128, 128>}, {pipeline_mode = #tpu.pipeline_mode<synchronous>, transform_indices = @transform_2, window_bounds = array<i64: 1, 128>}, {pipeline_mode = #tpu.pipeline_mode<synchronous>, transform_indices = @transform_3, window_bounds = array<i64: 128, 128>}, {pipeline_mode = #tpu.pipeline_mode<synchronous>, transform_indices = @transform_4, window_bounds = array<i64: 1, 128>}, {transform_indices = @transform_5, window_bounds = array<i64: 16, 128>}]} {
    %c0 = arith.constant 0 : index
    %c0_0 = arith.constant 0 : index
    %0 = vector.load %arg1[%c0, %c0_0] : memref<16x128xbf16, #tpu.memory_space<vmem>>, vector<16x128xbf16>
    %c0_1 = arith.constant 0 : index
    %c0_2 = arith.constant 0 : index
    %1 = vector.load %arg2[%c0_1, %c0_2] : memref<128x128xbf16, #tpu.memory_space<vmem>>, vector<128x128xbf16>
    %cst = arith.constant dense<0.000000e+00> : vector<16x128xf32>
    %2 = tpu.matmul %0, %1, %cst {dimension_numbers = #tpu.dot_dimension_numbers<[1], [0], [0], [1], [0, 0, 1, 1], [], []>} : vector<16x128xbf16>, vector<128x128xbf16>, vector<16x128xf32> -> vector<16x128xf32>
    %c0_3 = arith.constant 0 : index
    %c0_4 = arith.constant 0 : index
    %3 = vector.load %arg3[%c0_3, %c0_4] : memref<1x128xf32, #tpu.memory_space<vmem>>, vector<1x128xf32>
    %4 = vector.broadcast %3 : vector<1x128xf32> to vector<16x128xf32>
    %5 = arith.addf %2, %4 : vector<16x128xf32>
    %cst_5 = arith.constant 0.000000e+00 : f32
    %6 = vector.broadcast %cst_5 : f32 to vector<16x128xf32>
    %7 = arith.maximumf %5, %6 : vector<16x128xf32>
    %8 = arith.truncf %7 : vector<16x128xf32> to vector<16x128xbf16>
    %c0_6 = arith.constant 0 : index
    %c0_7 = arith.constant 0 : index
    %9 = vector.load %arg4[%c0_6, %c0_7] : memref<128x128xbf16, #tpu.memory_space<vmem>>, vector<128x128xbf16>
    %cst_8 = arith.constant dense<0.000000e+00> : vector<16x128xf32>
    %10 = tpu.matmul %8, %9, %cst_8 {dimension_numbers = #tpu.dot_dimension_numbers<[1], [0], [0], [1], [0, 0, 1, 1], [], []>} : vector<16x128xbf16>, vector<128x128xbf16>, vector<16x128xf32> -> vector<16x128xf32>
    %c0_9 = arith.constant 0 : index
    %c0_10 = arith.constant 0 : index
    %11 = vector.load %arg5[%c0_9, %c0_10] : memref<1x128xf32, #tpu.memory_space<vmem>>, vector<1x128xf32>
    %12 = vector.broadcast %11 : vector<1x128xf32> to vector<16x128xf32>
    %13 = arith.addf %10, %12 : vector<16x128xf32>
    %c0_11 = arith.constant 0 : index
    %c0_12 = arith.constant 0 : index
    %14 = vector.load %arg6[%c0_11, %c0_12] : memref<16x128xf32, #tpu.memory_space<vmem>>, vector<16x128xf32>
    tpu.vector_store %arg6[%c0_11, %c0_12], %13 {strides = array<i32>} : memref<16x128xf32, #tpu.memory_space<vmem>>, vector<16x128xf32>,
    return
  }
  func.func @transform_0(%arg0: i32) -> (i32, i32) {
    %c0_i32 = arith.constant 0 : i32
    %c0_i32_0 = arith.constant 0 : i32
    return %arg0, %c0_i32 : i32, i32
  }
  func.func @transform_1(%arg0: i32) -> (i32, i32) {
    %c0_i32 = arith.constant 0 : i32
    %c0_i32_0 = arith.constant 0 : i32
    %c0_i32_1 = arith.constant 0 : i32
    return %c0_i32, %c0_i32_0 : i32, i32
  }
  func.func @transform_2(%arg0: i32) -> (i32, i32) {
    %c0_i32 = arith.constant 0 : i32
    %c0_i32_0 = arith.constant 0 : i32
    %c0_i32_1 = arith.constant 0 : i32
    return %c0_i32, %c0_i32_0 : i32, i32
  }
  func.func @transform_3(%arg0: i32) -> (i32, i32) {
    %c0_i32 = arith.constant 0 : i32
    %c0_i32_0 = arith.constant 0 : i32
    %c0_i32_1 = arith.constant 0 : i32
    return %c0_i32, %c0_i32_0 : i32, i32
  }
  func.func @transform_4(%arg0: i32) -> (i32, i32) {
    %c0_i32 = arith.constant 0 : i32
    %c0_i32_0 = arith.constant 0 : i32
    %c0_i32_1 = arith.constant 0 : i32
    return %c0_i32, %c0_i32_0 : i32, i32
  }
  func.func @transform_5(%arg0: i32) -> (i32, i32) {
    %c0_i32 = arith.constant 0 : i32
    %c0_i32_0 = arith.constant 0 : i32
    return %arg0, %c0_i32 : i32, i32
  }
}

</mosaic_0001>

<bundles_post_ra>
// kernel: tpu_custom_call.1
= control target key start
LH: loop header
LB: loop body
LE: loop exit
PB: predicated region body
PF: predicated region fallthrough
CT: control target
= control target key end

     0   :  { %10 = vsyncpa [#allocation3], 0  ;;  %s518_s0 = inlined_call_operand.hbm [shape: bf16[16,128], index: 0, kind: input, shape index: {}]   ;;  %s519_s1 = inlined_call_operand.hbm [shape: bf16[128,128], index: 1, kind: input, shape index: {}]   ;;  %s520_s2 = inlined_call_operand.vmem [shape: f32[1,128], index: 2, kind: input, shape index: {}]   ;;  %s521_s3 = inlined_call_operand.hbm [shape: bf16[128,128], index: 3, kind: input, shape index: {}]   ;;  %s522_s4 = inlined_call_operand.vmem [shape: f32[1,128], index: 4, kind: input, shape index: {}]   ;;  %s523_s5 = inlined_call_operand.hbm [shape: f32[16,128], index: 5, kind: output, shape index: {}]  }
   0x1   :  { %11 = vsyncpa [#allocation6], 0 }
   0x2   :  { %12 = vsyncpa [#allocation4], 0  ;;  %s30_s20 = sshll.u32 %s519_s1, 4  ;;  %s462_s21 = smov [#allocation5]   ;;  %s31_s20 = int_to_ptr.hbm [resolvable:$true] %s30_s20 }
   0x3   :  { %s32_s22 = sshll.u32 %s462_s21, 4  ;;  %s17_s25 = sshll.u32 %s518_s0, 4  ;;  %s33_s22 = int_to_ptr.vmem [resolvable:$true] %s32_s22  ;;  %s18_s25 = int_to_ptr.hbm [resolvable:$true] %s17_s25 }
   0x4   :  { %s463_s26 = smov 64   ;;  %s464_s27 = smov 4  }
   0x5   :  { %38 = dma.hbm_to_vmem [thread:$0]  %s31_s20, 1024, %s33_s22, [#allocation6], %s463_s26, %s463_s26, %s464_s27  }
   0x6   :  { %s465_s28 = smov [#allocation2]   ;;  %s45_s7 = sshll.u32 %s521_s3, 4  ;;  %s46_s7 = int_to_ptr.hbm [resolvable:$true] %s45_s7 }
   0x7   :  { %s19_s29 = sshll.u32 %s465_s28, 4  ;;  %s466_s1 = smov [#allocation7]   ;;  %s20_s29 = int_to_ptr.vmem [resolvable:$true] %s19_s29 }
   0x8   :  { %25 = dma.hbm_to_vmem [thread:$0]  %s18_s25, 128, %s20_s29, [#allocation3], %s463_s26, %s463_s26, %s464_s27  }
   0x9   :  { %s47_s8 = sshll.u32 %s466_s1, 4  ;;  %s48_s8 = int_to_ptr.vmem [resolvable:$true] %s47_s8 }
   0xa   :  { %53 = dma.hbm_to_vmem [thread:$0]  %s46_s7, 1024, %s48_s8, [#allocation6], %s463_s26, %s463_s26, %s464_s27  }
   0xb   :  { %456 = dma.done.wait [#allocation3], 128  }
   0xc   :  { %457 = vsyncadd [#allocation3], 4294967168 }
   0xd   :  { %458 = dma.done.wait [#allocation6], 2048  }
   0xe   :  { %459 = vsyncadd [#allocation6], 4294965248  ;;  %v341_v0 = vld [vmem:[#allocation5 + $0x38] sm:$0xff]  ;;  %v340_v1 = vld [vmem:[#allocation5 + $0x30] sm:$0xff]  ;;  %s467_s11 = smov [#allocation8]   ;;  %s468_s15 = smov 128  }
   0xf   :  { %144 = vmatpush.bf16.msra.mxu0 %v341_v0  ;;  %v349_v2 = vld [vmem:[#allocation7 + $0x38] sm:$0xff]  ;;  %v348_v3 = vld [vmem:[#allocation7 + $0x30] sm:$0xff]  ;;  %v339_v4 = vld [vmem:[#allocation5 + $0x28] sm:$0xff]  ;;  %s249_s12 = sshll.u32 %s467_s11, 4  ;;  %s469_s16 = smov 8   ;;  %s250_s12 = int_to_ptr.vmem [resolvable:$true] %s249_s12 }
  0x10   :  { %229 = vmatpush.bf16.msra.mxu1 %v349_v2  ;;  %v347_v5 = vld [vmem:[#allocation7 + $0x28] sm:$0xff]  ;;  %v338_v6 = vld [vmem:[#allocation5 + $0x20] sm:$0xff]  ;;  %v337_v8 = vld [vmem:[#allocation5 + $0x18] sm:$0xff] }
  0x11   :  { %v346_v7 = vld [vmem:[#allocation7 + $0x20] sm:$0xff]  ;;  %v336_v9 = vld [vmem:[#allocation5 + $0x10] sm:$0xff]  ;;  %v335_v10 = vld [vmem:[#allocation5 + $0x8] sm:$0xff] }
  0x12   :  { %v334_v11 = vld [vmem:[#allocation5] sm:$0xff]  ;;  %v333_v12 = vld [vmem:[#allocation2] sm:$0xff]  ;;  %v344_v14 = vld [vmem:[#allocation7 + $0x10] sm:$0xff] }
  0x13   :  { %145 = vmatpush.bf16.msra.mxu0 %v340_v1  ;;  %v345_v13 = vld [vmem:[#allocation7 + $0x18] sm:$0xff]  ;;  %v343_v15 = vld [vmem:[#allocation7 + $0x8] sm:$0xff]  ;;  %v342_v16 = vld [vmem:[#allocation7] sm:$0xff] }
  0x14   :  { %230 = vmatpush.bf16.msra.mxu1 %v348_v3  ;;  %v358_v18 = vld [vmem:[%s520_s2] ss:$0 sm:$0xff]  ;;  %s251_s2 = sshll.u32 %s523_s5, 4  ;;  %s252_s2 = int_to_ptr.hbm [resolvable:$true] %s251_s2 }
  0x15   :  { %v359_v25 = vld [vmem:[%s522_s4] ss:$0 sm:$0xff] }
  0x17   :  { %146 = vmatpush.bf16.msra.mxu0 %v339_v4 }
  0x18   :  { %231 = vmatpush.bf16.msra.mxu1 %v347_v5 }
  0x1b   :  { %147 = vmatpush.bf16.msra.mxu0 %v338_v6 }
  0x1c   :  { %232 = vmatpush.bf16.msra.mxu1 %v346_v7 }
  0x1f   :  { %148 = vmatpush.bf16.msra.mxu0 %v337_v8 }
  0x20   :  { %233 = vmatpush.bf16.msra.mxu1 %v345_v13 }
  0x23   :  { %149 = vmatpush.bf16.msra.mxu0 %v336_v9 }
  0x24   :  { %234 = vmatpush.bf16.msra.mxu1 %v344_v14 }
  0x27   :  { %150 = vmatpush.bf16.msra.mxu0 %v335_v10 }
  0x28   :  { %235 = vmatpush.bf16.msra.mxu1 %v343_v15 }
  0x2b   :  { %151 = vmatpush.bf16.msra.mxu0 %v334_v11 }
  0x2c   :  { %236 = vmatpush.bf16.msra.mxu1 %v342_v16 }
  0x2e   :  { %152 = vmatmul.bf16.vlgmr.msra.gmra.mxu0 %v333_v12 }
  0xab   :  { %v153_v17 = vpop.f32.mrf.mxu0 }
  0xac   :  { %v154_v19 = vadd.f32 %v358_v18, %v153_v17 }
  0xae   :  { %v158_v22 = vmax.f32 %v154_v19, 0.0 }
  0xb3   :  { %v155_v20 = vpop.f32.mrf.mxu0 }
  0xb4   :  { %v156_v21 = vadd.f32 %v358_v18, %v155_v20 }
  0xb6   :  { %v159_v23 = vmax.f32 %v156_v21, 0.0 }
  0xb8   :  { %v160_v24 = vpack.c.bf16 %v159_v23, %v158_v22 }
  0xba   :  { %237 = vmatmul.bf16.vlgmr.msra.gmra.mxu1 %v160_v24 }
 0x137   :  { %v238_v26 = vpop.f32.mrf.mxu1 }
 0x138   :  { %v239_v27 = vadd.f32 %v359_v25, %v238_v26 }
 0x13a   :  { %243 = vst [vmem:[#allocation8] sm:$0xff] %v239_v27 }
 0x13f   :  { %v240_v28 = vpop.f32.mrf.mxu1 }
 0x140   :  { %v241_v29 = vadd.f32 %v359_v25, %v240_v28 }
 0x142   :  { %244 = vst [vmem:[#allocation8 + $0x8] sm:$0xff] %v241_v29 }
 0x143   :  { %257 = dma.vmem_to_hbm [thread:$0]  %s250_s12, 256, %s252_s2, [#allocation4], %s468_s15, %s468_s15, %s469_s16  }
 0x144   :  { %460 = dma.done.wait [#allocation4], 256  }
 0x145   :  { %461 = vsyncadd [#allocation4], 4294967040 }
 0x146   :  { %262 = vsyncpa [#allocation3], 1 }
 0x147   :  { %263 = vsyncpa [#allocation6], 1 }
 0x148   :  { %264 = vsyncpa [#allocation4], 1 }

</bundles_post_ra>
